<compile_context>
chip_gen: v6e
topology: v6e:2x2x1
jax: 0.10.0
libtpu: 0.0.40
codegen_flags: <defaults>
</compile_context>

<pallas_src>
import numpy as np
import jax
import jax.numpy as jnp
from jax.experimental import pallas as pl
from jax.experimental.pallas import tpu as pltpu

# ------------------------- hyper-parameters -------------------------
BATCH = 2
D_NUMERICAL = 8          # F == n_tokens (categories is None)
CHANNEL_DIM = 5          # FeatureWiseEmbedding channel_dim
D_TOKEN = 32
N_LAYERS = 2
D_FFN_FACTOR = 2.0
D_HIDDEN = int(D_TOKEN * D_FFN_FACTOR)
D_OUT = 1
LN_EPS = 1e-5

B, F, C, D, H, L = BATCH, D_NUMERICAL, CHANNEL_DIM, D_TOKEN, D_HIDDEN, N_LAYERS
BF, FC = B * F, F * C
LANES = 128
POOL_ROWS = 8            # pooling matrix kept as a full sublane tile (rows B..7 are zero)


def _round8(n):
    return (n + 7) // 8 * 8


# Packed-parameter layout: (name, (rows, cols)). Each block starts on an 8-row boundary
# so every in-kernel slice is sublane-tile aligned.
_PARAM_SPECS = [
    ("mfw",    (BF, FC)),        # FeatureWiseEmbedding weights, batch-tiled & block-diag masked
    ("mfb",    (BF, FC)),        # FeatureWiseEmbedding bias, batch-tiled & block-diag masked
    ("tw",     (FC, D)),         # tokenizer weight, flattened (f*C+c, d)
    ("tok_b",  (BF, D)),         # tokenizer bias, pre-tiled over batch
    ("ln_w",   (L, D)),
    ("ln_b",   (L, D)),
    ("w0",     (L * D, H)),      # linear0 weights, layers stacked on rows
    ("b0",     (L, H)),
    ("w1",     (L * H, D)),      # linear1 weights, layers stacked on rows
    ("b1",     (L, D)),
    ("pool",   (POOL_ROWS, BF)), # per-batch pooling matrix with last_fc weights baked in
    ("lln_w",  (1, D)),
    ("lln_b",  (1, D)),
    ("head_w", (1, D)),          # head weight as a row (d_out = 1)
]


def _build_layout():
    layout, off = {}, 0
    for name, (r, c) in _PARAM_SPECS:
        layout[name] = (off, r, c)
        off += _round8(r)
    return layout, off


LAYOUT, TOTAL_ROWS = _build_layout()


# ------------------------- Pallas kernel -------------------------
def ffn_kernel(x_ref, prm_ref, scal_ref, out_ref):
    alpha = scal_ref[0]      # PReLU slope
    lfc_b = scal_ref[1]      # last_fc bias
    head_b = scal_ref[2]     # head bias

    def ld(name):
        off, r, c = LAYOUT[name]
        return prm_ref[off:off + r, :c]

    def ld_layer(name, layer, rows_per):
        off, _, c = LAYOUT[name]
        return prm_ref[off + layer * rows_per: off + (layer + 1) * rows_per, :c]

    # --- FeatureWiseEmbedding + Tokenizer (fused, fully 2D) ---
    # e[r, f'*C+c] = x[r] * mfw[r, f'*C+c] + mfb[r, f'*C+c]  (zero outside own block)
    # PReLU(0) == 0, so the block-diagonal masking survives the activation;
    # x_tok = h @ tw + tok_bias  -> (B*F, D) in one MXU matmul.
    xcol = x_ref[...]                                  # (B*F, 1)
    e = xcol * ld("mfw") + ld("mfb")                   # (B*F, F*C)
    h = jnp.where(e >= 0.0, e, e * alpha)              # PReLU (single shared slope)
    x = jnp.dot(h, ld("tw"), preferred_element_type=jnp.float32) + ld("tok_b")   # (B*F, D)

    # --- pre-norm FFN transformer layers on (B*F, D) ---
    inv_d = 1.0 / D
    for layer in range(L):                             # static unroll (L == 2)
        s1 = jnp.sum(x, axis=-1, keepdims=True)
        s2 = jnp.sum(x * x, axis=-1, keepdims=True)
        mu = s1 * inv_d
        var = jnp.maximum(s2 * inv_d - mu * mu, 0.0)
        xr = (x - mu) * jax.lax.rsqrt(var + LN_EPS)
        xr = xr * ld_layer("ln_w", layer, 1) + ld_layer("ln_b", layer, 1)
        hh = jnp.dot(xr, ld_layer("w0", layer, D),
                     preferred_element_type=jnp.float32) + ld_layer("b0", layer, 1)
        hh = jnp.maximum(hh, 0.0)                      # activation = relu
        hh = jnp.dot(hh, ld_layer("w1", layer, H),
                     preferred_element_type=jnp.float32) + ld_layer("b1", layer, 1)
        x = x + hh                                     # residual (dropout = 0)

    # --- last_fc pooling over the token axis: one tiny MXU matmul, weights pre-baked ---
    pooled = jnp.dot(ld("pool"), x,
                     preferred_element_type=jnp.float32) + lfc_b   # (8, D); rows >= B are junk

    # --- last LayerNorm, last activation, head (VPU + lane reduction, no MXU) ---
    s1 = jnp.sum(pooled, axis=-1, keepdims=True)
    s2 = jnp.sum(pooled * pooled, axis=-1, keepdims=True)
    mu = s1 * inv_d
    var = jnp.maximum(s2 * inv_d - mu * mu, 0.0)
    z = (pooled - mu) * jax.lax.rsqrt(var + LN_EPS)
    z = z * ld("lln_w") + ld("lln_b")
    z = jnp.maximum(z, 0.0)
    o = jnp.sum(z * ld("head_w"), axis=-1, keepdims=True) + head_b   # (8, 1)
    out_ref[...] = jnp.broadcast_to(o, (POOL_ROWS, LANES))           # lane-dense full-vreg store


# ------------------------- wrapper -------------------------
def pack_params(p):
    f_row = np.arange(BF) % F
    f_col = np.arange(FC) // C
    tokmask = jnp.asarray((f_row[:, None] == f_col[None, :]).astype(np.float32))  # (BF, FC)

    fw_tiled = jnp.tile(p["fwe_w"].reshape(1, FC), (BF, 1))
    fb_tiled = jnp.tile(p["fwe_b"].reshape(1, FC), (BF, 1))

    # Pooling matrix: pool[b, b*F + f] = lfc_w[f]; rows B..7 stay zero.
    batch_onehot = np.zeros((POOL_ROWS, BF), np.float32)
    for b in range(B):
        batch_onehot[b, b * F:(b + 1) * F] = 1.0
    pool = jnp.asarray(batch_onehot) * jnp.tile(p["lfc_w"].reshape(1, F), (1, B))

    blocks = {
        "mfw": tokmask * fw_tiled,
        "mfb": tokmask * fb_tiled,
        "tw": p["tok_w"].reshape(FC, D),
        "tok_b": jnp.tile(p["tok_b"], (B, 1)),
        "ln_w": p["ln_w"],
        "ln_b": p["ln_b"],
        "w0": p["w0"].reshape(L * D, H),
        "b0": p["b0"],
        "w1": p["w1"].reshape(L * H, D),
        "b1": p["b1"],
        "pool": pool,
        "lln_w": p["lln_w"],
        "lln_b": p["lln_b"],
        "head_w": p["head_w"].reshape(1, D),
    }
    rows = []
    for name, (r, c) in _PARAM_SPECS:
        a = blocks[name].astype(jnp.float32)
        assert a.shape == (r, c), (name, a.shape, (r, c))
        rows.append(jnp.pad(a, ((0, _round8(r) - r), (0, LANES - c))))
    return jnp.concatenate(rows, axis=0)               # (TOTAL_ROWS, 128)


def ffn_forward(x_num, p):
    packed = pack_params(p)
    scalars = jnp.stack([p["prelu_a"][0, 0], p["lfc_b"][0, 0],
                         p["head_b"][0, 0]]).astype(jnp.float32)
    x_col = x_num.reshape(BF, 1).astype(jnp.float32)   # layout plumbing outside the kernel

    out = pl.pallas_call(
        ffn_kernel,
        out_shape=jax.ShapeDtypeStruct((POOL_ROWS, LANES), jnp.float32),
        in_specs=[pl.BlockSpec(memory_space=pltpu.MemorySpace.VMEM),   # x column
                  pl.BlockSpec(memory_space=pltpu.MemorySpace.VMEM),   # packed params
                  pl.BlockSpec(memory_space=pltpu.MemorySpace.SMEM)],  # scalars
        out_specs=pl.BlockSpec(memory_space=pltpu.MemorySpace.VMEM),
    )(x_col, packed, scalars)
    return out[:B, 0]                                  # x.squeeze(-1), d_out == 1


# ------------------------- pure-JAX reference -------------------------
def ffn_reference(x_num, p):
    e = x_num[:, :, None] * p["fwe_w"][None] + p["fwe_b"][None]
    e = jnp.where(e >= 0, e, e * p["prelu_a"][0, 0])
    x = jnp.einsum("bfc,fcd->bfd", e, p["tok_w"]) + p["tok_b"][None]
    for l in range(N_LAYERS):
        mu = x.mean(-1, keepdims=True)
        var = ((x - mu) ** 2).mean(-1, keepdims=True)
        xr = (x - mu) / jnp.sqrt(var + LN_EPS) * p["ln_w"][l] + p["ln_b"][l]
        h = jnp.maximum(xr @ p["w0"][l] + p["b0"][l], 0.0)
        h = h @ p["w1"][l] + p["b1"][l]
        x = x + h
    pooled = jnp.einsum("bfd,f->bd", x, p["lfc_w"][0]) + p["lfc_b"][0, 0]
    mu = pooled.mean(-1, keepdims=True)
    var = ((pooled - mu) ** 2).mean(-1, keepdims=True)
    z = (pooled - mu) / jnp.sqrt(var + LN_EPS) * p["lln_w"][0] + p["lln_b"][0]
    z = jnp.maximum(z, 0.0)
    out = z @ p["head_w"] + p["head_b"][0]
    return jnp.squeeze(out, -1) if D_OUT == 1 else out


# ------------------------- deterministic params -------------------------
def init_params(key):
    ks = jax.random.split(key, 12)
    u = lambda k, shape, s: jax.random.uniform(k, shape, jnp.float32, -s, s)
    p = {
        "fwe_w": jax.random.normal(ks[0], (D_NUMERICAL, CHANNEL_DIM), jnp.float32),
        "fwe_b": jnp.zeros((D_NUMERICAL, CHANNEL_DIM), jnp.float32),
        "prelu_a": jnp.full((1, 1), 0.25, jnp.float32),
        "tok_w": u(ks[1], (D_NUMERICAL, CHANNEL_DIM, D_TOKEN), 1.0 / (CHANNEL_DIM ** 0.5)),
        "tok_b": u(ks[2], (D_NUMERICAL, D_TOKEN), 1.0 / (CHANNEL_DIM ** 0.5)),
        "ln_w": jnp.ones((N_LAYERS, D_TOKEN), jnp.float32),
        "ln_b": jnp.zeros((N_LAYERS, D_TOKEN), jnp.float32),
        "w0": u(ks[3], (N_LAYERS, D_TOKEN, D_HIDDEN), 1.0 / (D_TOKEN ** 0.5)),
        "b0": u(ks[4], (N_LAYERS, D_HIDDEN), 1.0 / (D_TOKEN ** 0.5)),
        "w1": u(ks[5], (N_LAYERS, D_HIDDEN, D_TOKEN), 1.0 / (D_HIDDEN ** 0.5)),
        "b1": u(ks[6], (N_LAYERS, D_TOKEN), 1.0 / (D_HIDDEN ** 0.5)),
        "lfc_w": u(ks[7], (1, D_NUMERICAL), 1.0 / (D_NUMERICAL ** 0.5)),
        "lfc_b": u(ks[8], (1, 1), 1.0 / (D_NUMERICAL ** 0.5)),
        "lln_w": jnp.ones((1, D_TOKEN), jnp.float32),
        "lln_b": jnp.zeros((1, D_TOKEN), jnp.float32),
        "head_w": u(ks[9], (D_TOKEN, D_OUT), 1.0 / (D_TOKEN ** 0.5)),
        "head_b": u(ks[10], (1, D_OUT), 1.0 / (D_TOKEN ** 0.5)),
    }
    return p


if __name__ == "__main__":
    key = jax.random.PRNGKey(0)
    kp, kx = jax.random.split(key)
    params = init_params(kp)
    x_num = jax.random.normal(kx, (BATCH, D_NUMERICAL), jnp.float32)
    # x_cat = None (categories=None configuration)

    out = ffn_forward(x_num, params)
    out = jax.block_until_ready(out)

    ref = ffn_reference(x_num, params)
    assert out.shape == (BATCH,), out.shape
    assert jnp.allclose(out, ref, rtol=1e-4, atol=1e-4), (out, ref)
    print("KERNEL_OK")
</pallas_src>

<mosaic_0001>
module attributes {stable_mosaic.version = 11 : i64} {
  func.func @ffn_kernel(%arg0: memref<16x1xf32, #tpu.memory_space<vmem>>, %arg1: memref<344x128xf32, #tpu.memory_space<vmem>>, %arg2: memref<3xf32, #tpu.memory_space<smem>>, %arg3: memref<8x128xf32, #tpu.memory_space<vmem>>) attributes {dimension_semantics = [], scalar_prefetch = 0 : i64, scratch_operands = 0 : i64, tpu.core_type = #tpu.core_type<tc>} {
    %c0 = arith.constant 0 : index
    %0 = memref.load %arg2[%c0] : memref<3xf32, #tpu.memory_space<smem>>
    %c1 = arith.constant 1 : index
    %1 = memref.load %arg2[%c1] : memref<3xf32, #tpu.memory_space<smem>>
    %c2 = arith.constant 2 : index
    %2 = memref.load %arg2[%c2] : memref<3xf32, #tpu.memory_space<smem>>
    %c0_0 = arith.constant 0 : index
    %c0_1 = arith.constant 0 : index
    %3 = vector.load %arg0[%c0_0, %c0_1] : memref<16x1xf32, #tpu.memory_space<vmem>>, vector<16x1xf32>
    %c0_2 = arith.constant 0 : index
    %c0_3 = arith.constant 0 : index
    %4 = vector.load %arg1[%c0_2, %c0_3] : memref<344x128xf32, #tpu.memory_space<vmem>>, vector<16x40xf32>
    %5 = vector.broadcast %3 : vector<16x1xf32> to vector<16x40xf32>
    %6 = arith.mulf %5, %4 : vector<16x40xf32>
    %c16 = arith.constant 16 : index
    %c0_4 = arith.constant 0 : index
    %7 = vector.load %arg1[%c16, %c0_4] : memref<344x128xf32, #tpu.memory_space<vmem>>, vector<16x40xf32>
    %8 = arith.addf %6, %7 : vector<16x40xf32>
    %cst = arith.constant 0.000000e+00 : f32
    %9 = vector.broadcast %cst : f32 to vector<16x40xf32>
    %10 = arith.cmpf oge, %8, %9 : vector<16x40xf32>
    %11 = vector.broadcast %0 : f32 to vector<16x40xf32>
    %12 = arith.mulf %8, %11 : vector<16x40xf32>
    %13 = arith.select %10, %8, %12 : vector<16x40xi1>, vector<16x40xf32>
    %c32 = arith.constant 32 : index
    %c0_5 = arith.constant 0 : index
    %14 = vector.load %arg1[%c32, %c0_5] : memref<344x128xf32, #tpu.memory_space<vmem>>, vector<40x32xf32>
    %cst_6 = arith.constant dense<0.000000e+00> : vector<16x32xf32>
    %15 = tpu.matmul %13, %14, %cst_6 {dimension_numbers = #tpu.dot_dimension_numbers<[1], [0], [0], [1], [0, 0, 1, 1], [], []>} : vector<16x40xf32>, vector<40x32xf32>, vector<16x32xf32> -> vector<16x32xf32>
    %c72 = arith.constant 72 : index
    %c0_7 = arith.constant 0 : index
    %16 = vector.load %arg1[%c72, %c0_7] : memref<344x128xf32, #tpu.memory_space<vmem>>, vector<16x32xf32>
    %17 = arith.addf %15, %16 : vector<16x32xf32>
    %cst_8 = arith.constant dense<0.000000e+00> : vector<16xf32>
    %18 = vector.multi_reduction <add>, %17, %cst_8 [1] : vector<16x32xf32> to vector<16xf32>
    %19 = vector.shape_cast %18 : vector<16xf32> to vector<16x1xf32>
    %20 = arith.mulf %17, %17 : vector<16x32xf32>
    %cst_9 = arith.constant dense<0.000000e+00> : vector<16xf32>
    %21 = vector.multi_reduction <add>, %20, %cst_9 [1] : vector<16x32xf32> to vector<16xf32>
    %22 = vector.shape_cast %21 : vector<16xf32> to vector<16x1xf32>
    %cst_10 = arith.constant 3.125000e-02 : f32
    %23 = vector.broadcast %cst_10 : f32 to vector<16x1xf32>
    %24 = arith.mulf %19, %23 : vector<16x1xf32>
    %cst_11 = arith.constant 3.125000e-02 : f32
    %25 = vector.broadcast %cst_11 : f32 to vector<16x1xf32>
    %26 = arith.mulf %22, %25 : vector<16x1xf32>
    %27 = arith.mulf %24, %24 : vector<16x1xf32>
    %28 = arith.subf %26, %27 : vector<16x1xf32>
    %cst_12 = arith.constant 0.000000e+00 : f32
    %29 = vector.broadcast %cst_12 : f32 to vector<16x1xf32>
    %30 = arith.maximumf %28, %29 : vector<16x1xf32>
    %31 = vector.broadcast %24 : vector<16x1xf32> to vector<16x32xf32>
    %32 = arith.subf %17, %31 : vector<16x32xf32>
    %cst_13 = arith.constant 9.99999974E-6 : f32
    %33 = vector.broadcast %cst_13 : f32 to vector<16x1xf32>
    %34 = arith.addf %30, %33 : vector<16x1xf32>
    %35 = math.rsqrt %34 : vector<16x1xf32>
    %36 = vector.broadcast %35 : vector<16x1xf32> to vector<16x32xf32>
    %37 = arith.mulf %32, %36 : vector<16x32xf32>
    %c88 = arith.constant 88 : index
    %c0_14 = arith.constant 0 : index
    %38 = vector.load %arg1[%c88, %c0_14] : memref<344x128xf32, #tpu.memory_space<vmem>>, vector<1x32xf32>
    %39 = vector.broadcast %38 : vector<1x32xf32> to vector<16x32xf32>
    %40 = arith.mulf %37, %39 : vector<16x32xf32>
    %c96 = arith.constant 96 : index
    %c0_15 = arith.constant 0 : index
    %41 = vector.load %arg1[%c96, %c0_15] : memref<344x128xf32, #tpu.memory_space<vmem>>, vector<1x32xf32>
    %42 = vector.broadcast %41 : vector<1x32xf32> to vector<16x32xf32>
    %43 = arith.addf %40, %42 : vector<16x32xf32>
    %c104 = arith.constant 104 : index
    %c0_16 = arith.constant 0 : index
    %44 = vector.load %arg1[%c104, %c0_16] : memref<344x128xf32, #tpu.memory_space<vmem>>, vector<32x64xf32>
    %cst_17 = arith.constant dense<0.000000e+00> : vector<16x64xf32>
    %45 = tpu.matmul %43, %44, %cst_17 {dimension_numbers = #tpu.dot_dimension_numbers<[1], [0], [0], [1], [0, 0, 1, 1], [], []>} : vector<16x32xf32>, vector<32x64xf32>, vector<16x64xf32> -> vector<16x64xf32>
    %c168 = arith.constant 168 : index
    %c0_18 = arith.constant 0 : index
    %46 = vector.load %arg1[%c168, %c0_18] : memref<344x128xf32, #tpu.memory_space<vmem>>, vector<1x64xf32>
    %47 = vector.broadcast %46 : vector<1x64xf32> to vector<16x64xf32>
    %48 = arith.addf %45, %47 : vector<16x64xf32>
    %cst_19 = arith.constant 0.000000e+00 : f32
    %49 = vector.broadcast %cst_19 : f32 to vector<16x64xf32>
    %50 = arith.maximumf %48, %49 : vector<16x64xf32>
    %c176 = arith.constant 176 : index
    %c0_20 = arith.constant 0 : index
    %51 = vector.load %arg1[%c176, %c0_20] : memref<344x128xf32, #tpu.memory_space<vmem>>, vector<64x32xf32>
    %cst_21 = arith.constant dense<0.000000e+00> : vector<16x32xf32>
    %52 = tpu.matmul %50, %51, %cst_21 {dimension_numbers = #tpu.dot_dimension_numbers<[1], [0], [0], [1], [0, 0, 1, 1], [], []>} : vector<16x64xf32>, vector<64x32xf32>, vector<16x32xf32> -> vector<16x32xf32>
    %c304 = arith.constant 304 : index
    %c0_22 = arith.constant 0 : index
    %53 = vector.load %arg1[%c304, %c0_22] : memref<344x128xf32, #tpu.memory_space<vmem>>, vector<1x32xf32>
    %54 = vector.broadcast %53 : vector<1x32xf32> to vector<16x32xf32>
    %55 = arith.addf %52, %54 : vector<16x32xf32>
    %56 = arith.addf %17, %55 : vector<16x32xf32>
    %cst_23 = arith.constant dense<0.000000e+00> : vector<16xf32>
    %57 = vector.multi_reduction <add>, %56, %cst_23 [1] : vector<16x32xf32> to vector<16xf32>
    %58 = vector.shape_cast %57 : vector<16xf32> to vector<16x1xf32>
    %59 = arith.mulf %56, %56 : vector<16x32xf32>
    %cst_24 = arith.constant dense<0.000000e+00> : vector<16xf32>
    %60 = vector.multi_reduction <add>, %59, %cst_24 [1] : vector<16x32xf32> to vector<16xf32>
    %61 = vector.shape_cast %60 : vector<16xf32> to vector<16x1xf32>
    %cst_25 = arith.constant 3.125000e-02 : f32
    %62 = vector.broadcast %cst_25 : f32 to vector<16x1xf32>
    %63 = arith.mulf %58, %62 : vector<16x1xf32>
    %cst_26 = arith.constant 3.125000e-02 : f32
    %64 = vector.broadcast %cst_26 : f32 to vector<16x1xf32>
    %65 = arith.mulf %61, %64 : vector<16x1xf32>
    %66 = arith.mulf %63, %63 : vector<16x1xf32>
    %67 = arith.subf %65, %66 : vector<16x1xf32>
    %cst_27 = arith.constant 0.000000e+00 : f32
    %68 = vector.broadcast %cst_27 : f32 to vector<16x1xf32>
    %69 = arith.maximumf %67, %68 : vector<16x1xf32>
    %70 = vector.broadcast %63 : vector<16x1xf32> to vector<16x32xf32>
    %71 = arith.subf %56, %70 : vector<16x32xf32>
    %cst_28 = arith.constant 9.99999974E-6 : f32
    %72 = vector.broadcast %cst_28 : f32 to vector<16x1xf32>
    %73 = arith.addf %69, %72 : vector<16x1xf32>
    %74 = math.rsqrt %73 : vector<16x1xf32>
    %75 = vector.broadcast %74 : vector<16x1xf32> to vector<16x32xf32>
    %76 = arith.mulf %71, %75 : vector<16x32xf32>
    %c89 = arith.constant 89 : index
    %c0_29 = arith.constant 0 : index
    %77 = vector.load %arg1[%c89, %c0_29] : memref<344x128xf32, #tpu.memory_space<vmem>>, vector<1x32xf32>
    %78 = vector.broadcast %77 : vector<1x32xf32> to vector<16x32xf32>
    %79 = arith.mulf %76, %78 : vector<16x32xf32>
    %c97 = arith.constant 97 : index
    %c0_30 = arith.constant 0 : index
    %80 = vector.load %arg1[%c97, %c0_30] : memref<344x128xf32, #tpu.memory_space<vmem>>, vector<1x32xf32>
    %81 = vector.broadcast %80 : vector<1x32xf32> to vector<16x32xf32>
    %82 = arith.addf %79, %81 : vector<16x32xf32>
    %c136 = arith.constant 136 : index
    %c0_31 = arith.constant 0 : index
    %83 = vector.load %arg1[%c136, %c0_31] : memref<344x128xf32, #tpu.memory_space<vmem>>, vector<32x64xf32>
    %cst_32 = arith.constant dense<0.000000e+00> : vector<16x64xf32>
    %84 = tpu.matmul %82, %83, %cst_32 {dimension_numbers = #tpu.dot_dimension_numbers<[1], [0], [0], [1], [0, 0, 1, 1], [], []>} : vector<16x32xf32>, vector<32x64xf32>, vector<16x64xf32> -> vector<16x64xf32>
    %c169 = arith.constant 169 : index
    %c0_33 = arith.constant 0 : index
    %85 = vector.load %arg1[%c169, %c0_33] : memref<344x128xf32, #tpu.memory_space<vmem>>, vector<1x64xf32>
    %86 = vector.broadcast %85 : vector<1x64xf32> to vector<16x64xf32>
    %87 = arith.addf %84, %86 : vector<16x64xf32>
    %cst_34 = arith.constant 0.000000e+00 : f32
    %88 = vector.broadcast %cst_34 : f32 to vector<16x64xf32>
    %89 = arith.maximumf %87, %88 : vector<16x64xf32>
    %c240 = arith.constant 240 : index
    %c0_35 = arith.constant 0 : index
    %90 = vector.load %arg1[%c240, %c0_35] : memref<344x128xf32, #tpu.memory_space<vmem>>, vector<64x32xf32>
    %cst_36 = arith.constant dense<0.000000e+00> : vector<16x32xf32>
    %91 = tpu.matmul %89, %90, %cst_36 {dimension_numbers = #tpu.dot_dimension_numbers<[1], [0], [0], [1], [0, 0, 1, 1], [], []>} : vector<16x64xf32>, vector<64x32xf32>, vector<16x32xf32> -> vector<16x32xf32>
    %c305 = arith.constant 305 : index
    %c0_37 = arith.constant 0 : index
    %92 = vector.load %arg1[%c305, %c0_37] : memref<344x128xf32, #tpu.memory_space<vmem>>, vector<1x32xf32>
    %93 = vector.broadcast %92 : vector<1x32xf32> to vector<16x32xf32>
    %94 = arith.addf %91, %93 : vector<16x32xf32>
    %95 = arith.addf %56, %94 : vector<16x32xf32>
    %c312 = arith.constant 312 : index
    %c0_38 = arith.constant 0 : index
    %96 = vector.load %arg1[%c312, %c0_38] : memref<344x128xf32, #tpu.memory_space<vmem>>, vector<8x16xf32>
    %cst_39 = arith.constant dense<0.000000e+00> : vector<8x32xf32>
    %97 = tpu.matmul %96, %95, %cst_39 {dimension_numbers = #tpu.dot_dimension_numbers<[1], [0], [0], [1], [0, 0, 1, 1], [], []>} : vector<8x16xf32>, vector<16x32xf32>, vector<8x32xf32> -> vector<8x32xf32>
    %98 = vector.broadcast %1 : f32 to vector<8x32xf32>
    %99 = arith.addf %97, %98 : vector<8x32xf32>
    %cst_40 = arith.constant dense<0.000000e+00> : vector<8xf32>
    %100 = vector.multi_reduction <add>, %99, %cst_40 [1] : vector<8x32xf32> to vector<8xf32>
    %101 = vector.shape_cast %100 : vector<8xf32> to vector<8x1xf32>
    %102 = arith.mulf %99, %99 : vector<8x32xf32>
    %cst_41 = arith.constant dense<0.000000e+00> : vector<8xf32>
    %103 = vector.multi_reduction <add>, %102, %cst_41 [1] : vector<8x32xf32> to vector<8xf32>
    %104 = vector.shape_cast %103 : vector<8xf32> to vector<8x1xf32>
    %cst_42 = arith.constant 3.125000e-02 : f32
    %105 = vector.broadcast %cst_42 : f32 to vector<8x1xf32>
    %106 = arith.mulf %101, %105 : vector<8x1xf32>
    %cst_43 = arith.constant 3.125000e-02 : f32
    %107 = vector.broadcast %cst_43 : f32 to vector<8x1xf32>
    %108 = arith.mulf %104, %107 : vector<8x1xf32>
    %109 = arith.mulf %106, %106 : vector<8x1xf32>
    %110 = arith.subf %108, %109 : vector<8x1xf32>
    %cst_44 = arith.constant 0.000000e+00 : f32
    %111 = vector.broadcast %cst_44 : f32 to vector<8x1xf32>
    %112 = arith.maximumf %110, %111 : vector<8x1xf32>
    %113 = vector.broadcast %106 : vector<8x1xf32> to vector<8x32xf32>
    %114 = arith.subf %99, %113 : vector<8x32xf32>
    %cst_45 = arith.constant 9.99999974E-6 : f32
    %115 = vector.broadcast %cst_45 : f32 to vector<8x1xf32>
    %116 = arith.addf %112, %115 : vector<8x1xf32>
    %117 = math.rsqrt %116 : vector<8x1xf32>
    %118 = vector.broadcast %117 : vector<8x1xf32> to vector<8x32xf32>
    %119 = arith.mulf %114, %118 : vector<8x32xf32>
    %c320 = arith.constant 320 : index
    %c0_46 = arith.constant 0 : index
    %120 = vector.load %arg1[%c320, %c0_46] : memref<344x128xf32, #tpu.memory_space<vmem>>, vector<1x32xf32>
    %121 = vector.broadcast %120 : vector<1x32xf32> to vector<8x32xf32>
    %122 = arith.mulf %119, %121 : vector<8x32xf32>
    %c328 = arith.constant 328 : index
    %c0_47 = arith.constant 0 : index
    %123 = vector.load %arg1[%c328, %c0_47] : memref<344x128xf32, #tpu.memory_space<vmem>>, vector<1x32xf32>
    %124 = vector.broadcast %123 : vector<1x32xf32> to vector<8x32xf32>
    %125 = arith.addf %122, %124 : vector<8x32xf32>
    %cst_48 = arith.constant 0.000000e+00 : f32
    %126 = vector.broadcast %cst_48 : f32 to vector<8x32xf32>
    %127 = arith.maximumf %125, %126 : vector<8x32xf32>
    %c336 = arith.constant 336 : index
    %c0_49 = arith.constant 0 : index
    %128 = vector.load %arg1[%c336, %c0_49] : memref<344x128xf32, #tpu.memory_space<vmem>>, vector<1x32xf32>
    %129 = vector.broadcast %128 : vector<1x32xf32> to vector<8x32xf32>
    %130 = arith.mulf %127, %129 : vector<8x32xf32>
    %cst_50 = arith.constant dense<0.000000e+00> : vector<8xf32>
    %131 = vector.multi_reduction <add>, %130, %cst_50 [1] : vector<8x32xf32> to vector<8xf32>
    %132 = vector.shape_cast %131 : vector<8xf32> to vector<8x1xf32>
    %133 = vector.broadcast %2 : f32 to vector<8x1xf32>
    %134 = arith.addf %132, %133 : vector<8x1xf32>
    %135 = vector.shape_cast %134 : vector<8x1xf32> to vector<8x1xf32>
    %136 = vector.broadcast %135 : vector<8x1xf32> to vector<8x128xf32>
    %c0_51 = arith.constant 0 : index
    %c0_52 = arith.constant 0 : index
    %137 = vector.load %arg3[%c0_51, %c0_52] : memref<8x128xf32, #tpu.memory_space<vmem>>, vector<8x128xf32>
    tpu.vector_store %arg3[%c0_51, %c0_52], %136 {strides = array<i32>} : memref<8x128xf32, #tpu.memory_space<vmem>>, vector<8x128xf32>,
    return
  }
}

</mosaic_0001>

<bundles_post_ra>
// kernel: tpu_custom_call.1
= control target key start
LH: loop header
LB: loop body
LE: loop exit
PB: predicated region body
PF: predicated region fallthrough
CT: control target
= control target key end

     0   :  { %8 = vsyncpa [#allocation3], 0  ;;  %s1077_s0 = inlined_call_operand.vmem [shape: f32[16,1], index: 0, kind: input, shape index: {}]   ;;  %s1078_s1 = inlined_call_operand.hbm [shape: f32[344,128], index: 1, kind: input, shape index: {}]   ;;  %s1079_s2 = inlined_call_operand.vmem [shape: f32[3], index: 2, kind: input, shape index: {}]   ;;  %s1080_s3 = inlined_call_operand.hbm [shape: f32[8,128], index: 3, kind: output, shape index: {}]  }
   0x1   :  { %9 = vsyncpa [#allocation5], 0 }
   0x2   :  { %10 = vsyncpa [#allocation4], 0  ;;  %s987_s12 = smov [#allocation2]   ;;  %s31_s16 = sshll.u32 %s1079_s2, 4  ;;  %s32_s16 = int_to_ptr.vmem [resolvable:$true] %s31_s16 }
   0x3   :  { %s18_s13 = sshll.u32 %s987_s12, 4  ;;  %s19_s13 = int_to_ptr.vmem [resolvable:$true] %s18_s13 }
   0x4   :  { %s937_s17 = scalar_lea.vmem %s19_s13, 5504  ;;  %p942_p1 = scmp.lt.s32.totalorder %s19_s13, %s19_s13 }
   0x5   :  { %p938_p0 = scmp.ne.s32.totalorder %s19_s13, %s937_s17  ;;  %p943_p2 = scmp.lt.s32.totalorder %s937_s17, %s937_s17 }
   0x7   :  { %p944_p3 = por %p943_p2, %p942_p1 }
   0x9   :  { %p945_p4 = pnand %p944_p3, %p938_p0 }
   0xb   :  { %948 = shalt.err (!%p945_p4)
}
   0xc   :  { %s988_s18 = smov 128   ;;  %s989_s19 = smov 8  }
   0xd   :  { %24 = dma.hbm_to_vmem [thread:$0]  %s1078_s1, 5504, %s19_s13, [#allocation3], %s988_s18, %s988_s18, %s989_s19  }
   0xe   :  { %s949_s22 = scalar_lea.vmem %s32_s16, 16  ;;  %p954_p6 = scmp.lt.s32.totalorder %s32_s16, %s32_s16 }
   0xf   :  { %p950_p5 = scmp.ne.s32.totalorder %s32_s16, %s949_s22  ;;  %p955_p7 = scmp.lt.s32.totalorder %s949_s22, %s949_s22 }
  0x11   :  { %p956_p8 = por %p955_p7, %p954_p6 }
  0x13   :  { %p957_p9 = pnand %p956_p8, %p950_p5 }
  0x15   :  { %960 = shalt.err (!%p957_p9)
}
  0x16   :  { %s990_s2 = smov [#allocation6]  }
  0x17   :  { %34 = dma.vmem_to_smem %s32_s16, 16, %s990_s2, [#allocation5]  }
  0x18   :  { %981 = dma.done.wait [#allocation3], 5504  }
  0x19   :  { %982 = vsyncadd [#allocation3], 4294961792 }
  0x1a   :  { %983 = dma.done.wait [#allocation5], 16  }
  0x1b   :  { %984 = vsyncadd [#allocation5], 4294967280 }
  0x1c   :  { %41 = sfence }
  0x1d   :  { %v45_v0 = vld [vmem:[%s1077_s0] sm:$0xff]  ;;  %v991_v1 = vmov 0   ;;  %v75_v3 = vld [vmem:[#allocation2 + $0x38] sm:$0xff]  ;;  %v46_v4 = vld [vmem:[%s1077_s0 + $0x8] sm:$0xff]  ;;  %s42_s26 = sld [smem:[#allocation6]]  ;;  %vm79_vm1 = vcmask 326656  }
  0x1e   :  { %918 = vset.pattern.permute.xlu0 %v991_v1  ;;  %v76_v2 = vld [vmem:[#allocation2 + $0x40] sm:$0xff]  ;;  %v74_v5 = vld [vmem:[#allocation2 + $0x30] sm:$0xff]  ;;  %v73_v6 = vld [vmem:[#allocation2 + $0x28] sm:$0xff]  ;;  %vm161_vm3 = vcmask 261120   ;;  %vm313_vm4 = vcmask 523264   ;;  %vm993_vm5 = vmmov 0  }
  0x1f   :  { %51 = vperm.xlu0 %918, %v45_v0   ;;  %830 = vmatprep.subr.mxu0 %v76_v2  ;;  %v72_v7 = vld [vmem:[#allocation2 + $0x20] sm:$0xff]  ;;  %v61_v9 = vld [vmem:[#allocation2 + $0x10] sm:$0xff]  ;;  %v48_v12 = vld [vmem:[#allocation2 + $0x8] sm:$0xff]  ;;  %vm633_vm6 = vcmask 130048   ;;  %s764_s0 = sld [smem:[#allocation6 + $0x1]]  ;;  %s994_s28 = smov [#allocation7]  }
  0x20   :  { %831 = vmatpush3.msra.mxu0 %v76_v2  ;;  %v47_v8 = vld [vmem:[#allocation2] sm:$0xff]  ;;  %v62_v15 = vld [vmem:[#allocation2 + $0x18] sm:$0xff]  ;;  %v78_v23 = vld [vmem:[#allocation2 + $0x50] sm:$0xff]  ;;  %s765_s27 = sld [smem:[#allocation6 + $0x2]]  ;;  %s754_s29 = sshll.u32 %s994_s28, 4  ;;  %s755_s29 = int_to_ptr.vmem [resolvable:$true] %s754_s29 }
  0x21   :  { %832 = vmatprep.subr.mxu0 %v75_v3  ;;  %v77_v25 = vld [vmem:[#allocation2 + $0x48] sm:$0xff]  ;;  %v211_v35 = vld [vmem:[#allocation2 + $0x80] sm:$0xff]  ;;  %v210_v36 = vld [vmem:[#allocation2 + $0x78] sm:$0xff]  ;;  %s961_s30 = scalar_lea.vmem %s755_s29, 128  ;;  %p966_p11 = scmp.lt.s32.totalorder %s755_s29, %s755_s29 }
  0x22   :  { %833 = vmatpush3.msra.mxu0 %v75_v3  ;;  %843 = vmatprep.subr.mxu1 %v211_v35  ;;  %v209_v37 = vld [vmem:[#allocation2 + $0x70] sm:$0xff]  ;;  %v208_v38 = vld [vmem:[#allocation2 + $0x68] sm:$0xff]  ;;  %v768_v58 = vld [vmem:[#allocation2 + $0x58] ss:$0 sm:$0xff]  ;;  %p962_p10 = scmp.ne.s32.totalorder %s755_s29, %s961_s30  ;;  %p967_p12 = scmp.lt.s32.totalorder %s961_s30, %s961_s30 }
  0x23   :  { %56 = vperm.xlu0 %918, %v46_v4   ;;  %834 = vmatprep.subr.mxu0 %v74_v5  ;;  %v67_v13 = vstv %s42_s26  ;;  %v307_v39 = vld [vmem:[#allocation2 + $0xe8] sm:$0xff]  ;;  %v769_v62 = vld [vmem:[#allocation2 + $0x60] ss:$0 sm:$0xff] }
  0x24   :  { %835 = vmatpush3.msra.mxu0 %v74_v5  ;;  %844 = vmatpush3.msra.mxu1 %v211_v35  ;;  %v306_v4 = vld [vmem:[#allocation2 + $0xe0] sm:$0xff]  ;;  %v305_v5 = vld [vmem:[#allocation2 + $0xd8] sm:$0xff]  ;;  %v542_v35 = vld [vmem:[#allocation2 + $0x128] sm:$0xff]  ;;  %p968_p13 = por %p967_p12, %p966_p11 }
  0x25   :  { %836 = vmatprep.subr.mxu0 %v73_v6  ;;  %845 = vmatprep.subr.mxu1 %v210_v36 }
  0x26   :  { %837 = vmatpush3.msra.mxu0 %v73_v6  ;;  %846 = vmatpush3.msra.mxu1 %v210_v36  ;;  %v304_v6 = vld [vmem:[#allocation2 + $0xd0] sm:$0xff]  ;;  %p969_p0 = pnand %p968_p13, %p962_p10 }
  0x27   :  { %838 = vmatprep.subr.mxu0 %v72_v7  ;;  %847 = vmatprep.subr.mxu1 %v209_v37 }
  0x28   :  { %839 = vmatpush3.msra.mxu0 %v72_v7  ;;  %848 = vmatpush3.msra.mxu1 %v209_v37  ;;  %v303_v7 = vld [vmem:[#allocation2 + $0xc8] sm:$0xff] }
  0x29   :  { %849 = vmatprep.subr.mxu1 %v208_v38 }
  0x2a   :  { %850 = vmatpush3.msra.mxu1 %v208_v38 }
  0x2b   :  { %854 = vmatprep.subr.mxu1 %v307_v39 }
  0x9a   :  { %v52_v10 = vpop.permute.xlu0 %51 }
  0x9b   :  { %v59_v11 = vmul.f32 %v52_v10, %v47_v8  ;;  %v302_v8 = vld [vmem:[#allocation2 + $0xc0] sm:$0xff]  ;;  %v300_v10 = vld [vmem:[#allocation2 + $0xb0] sm:$0xff] }
  0x9d   :  { %v63_v14 = vadd.f32 %v61_v9, %v59_v11  ;;  %v301_v9 = vld [vmem:[#allocation2 + $0xb8] sm:$0xff]  ;;  %v770_v11 = vld [vmem:[#allocation2 + $0xa8] ss:$0 sm:$0xff] }
  0x9e   :  { %v57_v16 = vpop.permute.xlu0 %56 }
  0x9f   :  { %v60_v17 = vmul.f32 %v57_v16, %v48_v12  ;;  %vm65_vm0 = vcmp.ge.f32.partialorder %v63_v14, 0.0  ;;  %v68_v18 = vmul.f32 %v67_v13, %v63_v14 }
  0xa1   :  { %v64_v19 = vadd.f32 %v62_v15, %v60_v17  ;;  %v70_v20 = vsel %vm65_vm0, %v63_v14, %v68_v18  ;;  %v773_v18 = vld [vmem:[#allocation2 + $0x130] ss:$0 sm:$0xff] }
  0xa2   :  { %840 = vmatprep.mubr.msk.f32.mxu0 %vm79_vm1, %v70_v20 }
  0xa3   :  { %v69_v21 = vmul.f32 %v67_v13, %v64_v19  ;;  %vm66_vm2 = vcmp.ge.f32.partialorder %v64_v19, 0.0 }
  0xa5   :  { %v71_v22 = vsel %vm66_vm2, %v64_v19, %v69_v21 }
  0xa6   :  { %841 = vmatmul.mubr.msk.f32.vlgmr.msra.gmra.mxu0 %vm79_vm1, %v71_v22 }
 0x166   :  { %v842_v24 = vpop.f32.mrf.mxu0 }
 0x167   :  { %v1027_v26 = vadd.f32 %v842_v24, %v78_v23 }
 0x168   :  { %v152_v27 = vpop.f32.mrf.mxu0 }
 0x169   :  { %v1029_v28 = vadd.f32 %v152_v27, %v77_v25  ;;  %v165_v29 = vsel %vm161_vm3, %v1027_v26, 0.0  ;;  %v169_v33 = vmul.f32 %v1027_v26, %v1027_v26 }
 0x16a   :  { %166 = vadd.xlane.f32.xlu1 %v165_v29 }
 0x16b   :  { %v168_v30 = vmul.f32 %v1029_v28, %v1029_v28  ;;  %v162_v32 = vsel %vm161_vm3, %v1029_v28, 0.0  ;;  %v173_v34 = vsel %vm161_vm3, %v169_v33, 0.0  ;;  %v444_v33 = vld [vmem:[#allocation2 + $0x90] sm:$0xff] }
 0x16d   :  { %v170_v31 = vsel %vm161_vm3, %v168_v30, 0.0 }
 0x16e   :  { %171 = vadd.xlane.f32.xlu0 %v170_v31  ;;  %163 = vadd.xlane.f32.xlu1 %v162_v32  ;;  %v446_v31 = vld [vmem:[#allocation2 + $0xa0] sm:$0xff]  ;;  %v445_v32 = vld [vmem:[#allocation2 + $0x98] sm:$0xff] }
 0x16f   :  { %873 = vmatprep.subr.mxu0 %v446_v31 }
 0x170   :  { %874 = vmatpush3.msra.mxu0 %v446_v31 }
 0x171   :  { %875 = vmatprep.subr.mxu0 %v445_v32 }
 0x172   :  { %174 = vadd.xlane.f32.xlu1 %v173_v34  ;;  %876 = vmatpush3.msra.mxu0 %v445_v32  ;;  %v443_v34 = vld [vmem:[#allocation2 + $0x88] sm:$0xff] }
 0x173   :  { %877 = vmatprep.subr.mxu0 %v444_v33 }
 0x174   :  { %878 = vmatpush3.msra.mxu0 %v444_v33 }
 0x175   :  { %879 = vmatprep.subr.mxu0 %v443_v34 }
 0x176   :  { %880 = vmatpush3.msra.mxu0 %v443_v34 }
 0x177   :  { %884 = vmatprep.subr.mxu0 %v542_v35 }
 0x1f3   :  { %v167_v40 = vpop.xlane.xlu1 %166 }
 0x1f4   :  { %v177_v43 = vmul.f32 0.03125, %v167_v40 }
 0x1f6   :  { %v181_v48 = vmul.f32 %v177_v43, %v177_v43  ;;  %v187_v59 = vsub.f32 %v1027_v26, %v177_v43 }
 0x1f7   :  { %v172_v41 = vpop.xlane.xlu0 %171  ;;  %v164_v42 = vpop.xlane.xlu1 %163 }
 0x1f8   :  { %v176_v44 = vmul.f32 0.03125, %v164_v42  ;;  %v178_v45 = vmul.f32 0.03125, %v172_v41 }
 0x1fa   :  { %v180_v46 = vmul.f32 %v176_v44, %v176_v44  ;;  %v186_v56 = vsub.f32 %v1029_v28, %v176_v44 }
 0x1fb   :  { %v175_v47 = vpop.xlane.xlu1 %174 }
 0x1fc   :  { %v182_v49 = vsub.f32 %v178_v45, %v180_v46  ;;  %v179_v50 = vmul.f32 0.03125, %v175_v47 }
 0x1fe   :  { %v184_v51 = vmax.f32 %v182_v49, 0.0  ;;  %v183_v52 = vsub.f32 %v179_v50, %v181_v48 }
 0x200   :  { %v188_v53 = vadd.f32 1e-05, %v184_v51  ;;  %v185_v54 = vmax.f32 %v183_v52, 0.0 }
 0x202   :  { %919 = vrsqrt.f32 %v188_v53  ;;  %v189_v55 = vadd.f32 1e-05, %v185_v54  ;;  %v776_v54 = vld [vmem:[#allocation2 + $0x59] ss:$0 sm:$0xff] }
 0x204   :  { %921 = vrsqrt.f32 %v189_v55 }
 0x20f   :  { %v920_v57 = vpop.eup %919 }
 0x210   :  { %v192_v60 = vmul.f32 %v920_v57, %v186_v56  ;;  %v777_v56 = vld [vmem:[#allocation2 + $0x61] ss:$0 sm:$0xff] }
 0x211   :  { %v922_v61 = vpop.eup %921 }
 0x212   :  { %v193_v63 = vmul.f32 %v922_v61, %v187_v59  ;;  %v199_v0 = vmul.f32 %v768_v58, %v192_v60 }
 0x214   :  { %v200_v1 = vmul.f32 %v768_v58, %v193_v63  ;;  %v206_v2 = vadd.f32 %v769_v62, %v199_v0  ;;  %v541_v0 = vld [vmem:[#allocation2 + $0x120] sm:$0xff] }
 0x216   :  { %v207_v3 = vadd.f32 %v769_v62, %v200_v1  ;;  %851 = vmatprep.mubr.msk.f32.mxu1 %vm161_vm3, %v206_v2  ;;  %v540_v1 = vld [vmem:[#allocation2 + $0x118] sm:$0xff]  ;;  %v539_v2 = vld [vmem:[#allocation2 + $0x110] sm:$0xff] }
 0x218   :  { %852 = vmatmul.mubr.msk.f32.vlgmr.msra.gmra.mxu1 %vm161_vm3, %v207_v3  ;;  %v538_v3 = vld [vmem:[#allocation2 + $0x108] sm:$0xff] }
 0x219   :  { %855 = vmatpush3.msra.mxu1 %v307_v39 }
 0x21a   :  { %856 = vmatprep.subr.mxu1 %v306_v4 }
 0x21b   :  { %857 = vmatpush3.msra.mxu1 %v306_v4  ;;  %v537_v4 = vld [vmem:[#allocation2 + $0x100] sm:$0xff] }
 0x21c   :  { %858 = vmatprep.subr.mxu1 %v305_v5 }
 0x21d   :  { %859 = vmatpush3.msra.mxu1 %v305_v5  ;;  %v536_v5 = vld [vmem:[#allocation2 + $0xf8] sm:$0xff] }
 0x21e   :  { %860 = vmatprep.subr.mxu1 %v304_v6 }
 0x21f   :  { %861 = vmatpush3.msra.mxu1 %v304_v6  ;;  %v535_v6 = vld [vmem:[#allocation2 + $0xf0] sm:$0xff] }
 0x220   :  { %862 = vmatprep.subr.mxu1 %v303_v7 }
 0x221   :  { %863 = vmatpush3.msra.mxu1 %v303_v7  ;;  %v778_v7 = vld [vmem:[#allocation2 + $0xa9] ss:$0 sm:$0xff] }
 0x222   :  { %864 = vmatprep.subr.mxu1 %v302_v8 }
 0x223   :  { %865 = vmatpush3.msra.mxu1 %v302_v8 }
 0x224   :  { %866 = vmatprep.subr.mxu1 %v301_v9 }
 0x225   :  { %867 = vmatpush3.msra.mxu1 %v301_v9 }
 0x226   :  { %868 = vmatprep.subr.mxu1 %v300_v10 }
 0x227   :  { %869 = vmatpush3.msra.mxu1 %v300_v10 }
 0x2d8   :  { %v853_v12 = vpop.f32.mrf.mxu1 }
 0x2d9   :  { %v295_v13 = vadd.f32 %v853_v12, %v770_v11 }
 0x2da   :  { %v289_v14 = vpop.f32.mrf.mxu1 }
 0x2db   :  { %v290_v15 = vadd.f32 %v770_v11, %v289_v14  ;;  %v299_v17 = vmax.f32 %v295_v13, 0.0  ;;  %v992_v14 = vmov 0.0  }
 0x2dc   :  { %903 = vmatprep.subr.mxu1 %v992_v14 }
 0x2dd   :  { %v298_v16 = vmax.f32 %v290_v15, 0.0  ;;  %v781_v15 = vld [vmem:[#allocation2 + $0x131] ss:$0 sm:$0xff] }
 0x2df   :  { %870 = vmatprep.mubr.msk.f32.mxu1 %vm313_vm4, %v298_v16 }
 0x2e0   :  { %871 = vmatmul.mubr.msk.f32.vlgmr.msra.gmra.mxu1 %vm313_vm4, %v299_v17 }
 0x2e1   :  { %907 = vmatprep.mubr.msk.f32.mxu1 %vm993_vm5, %v992_v14 }
 0x3a0   :  { %v872_v19 = vpop.f32.mrf.mxu1 }
 0x3a1   :  { %v392_v20 = vadd.f32 %v872_v19, %v773_v18 }
 0x3a2   :  { %v386_v21 = vpop.f32.mrf.mxu1 }
 0x3a3   :  { %v1048_v22 = vadd.f32 %v392_v20, %v1027_v26  ;;  %v387_v23 = vadd.f32 %v773_v18, %v386_v21 }
 0x3a5   :  { %v1051_v24 = vadd.f32 %v387_v23, %v1029_v28  ;;  %v400_v25 = vsel %vm161_vm3, %v1048_v22, 0.0  ;;  %v404_v26 = vmul.f32 %v1048_v22, %v1048_v22  ;;  %v631_v23 = vld [vmem:[#allocation2 + $0x138] sm:$0xff] }
 0x3a6   :  { %401 = vadd.xlane.f32.xlu1 %v400_v25  ;;  %v632_v25 = vstv %s764_s0 }
 0x3a7   :  { %v397_v27 = vsel %vm161_vm3, %v1051_v24, 0.0  ;;  %v403_v29 = vmul.f32 %v1051_v24, %v1051_v24  ;;  %v408_v28 = vsel %vm161_vm3, %v404_v26, 0.0 }
 0x3a9   :  { %v405_v30 = vsel %vm161_vm3, %v403_v29, 0.0 }
 0x3aa   :  { %398 = vadd.xlane.f32.xlu1 %v397_v27 }
 0x3ae   :  { %406 = vadd.xlane.f32.xlu1 %v405_v30 }
 0x3b2   :  { %409 = vadd.xlane.f32.xlu1 %v408_v28 }
 0x42f   :  { %v402_v36 = vpop.xlane.xlu1 %401 }
 0x430   :  { %v412_v40 = vmul.f32 0.03125, %v402_v36 }
 0x432   :  { %v416_v45 = vmul.f32 %v412_v40, %v412_v40  ;;  %v422_v57 = vsub.f32 %v1048_v22, %v412_v40  ;;  %v785_v40 = vld [vmem:[#allocation2 + $0x140] ss:$0 sm:$0xff] }
 0x433   :  { %v399_v37 = vpop.xlane.xlu1 %398 }
 0x434   :  { %v411_v38 = vmul.f32 0.03125, %v399_v37 }
 0x436   :  { %v415_v41 = vmul.f32 %v411_v38, %v411_v38  ;;  %v421_v52 = vsub.f32 %v1051_v24, %v411_v38 }
 0x437   :  { %v407_v39 = vpop.xlane.xlu1 %406 }
 0x438   :  { %v413_v42 = vmul.f32 0.03125, %v407_v39 }
 0x43a   :  { %v417_v43 = vsub.f32 %v413_v42, %v415_v41  ;;  %v786_v42 = vld [vmem:[#allocation2 + $0x148] ss:$0 sm:$0xff] }
 0x43b   :  { %v410_v44 = vpop.xlane.xlu1 %409 }
 0x43c   :  { %v419_v46 = vmax.f32 %v417_v43, 0.0  ;;  %v414_v47 = vmul.f32 0.03125, %v410_v44 }
 0x43e   :  { %v423_v48 = vadd.f32 1e-05, %v419_v46  ;;  %v418_v49 = vsub.f32 %v414_v47, %v416_v45  ;;  %v787_v45 = vld [vmem:[#allocation2 + $0x150] ss:$0 sm:$0xff] }
 0x440   :  { %923 = vrsqrt.f32 %v423_v48  ;;  %v420_v50 = vmax.f32 %v418_v49, 0.0  ;;  %v745_v49 = vstv %s765_s27 }
 0x442   :  { %v424_v51 = vadd.f32 1e-05, %v420_v50 }
 0x444   :  { %925 = vrsqrt.f32 %v424_v51 }
 0x44d   :  { %v924_v53 = vpop.eup %923 }
 0x44e   :  { %v427_v55 = vmul.f32 %v924_v53, %v421_v52 }
 0x450   :  { %v434_v58 = vmul.f32 %v776_v54, %v427_v55 }
 0x451   :  { %v926_v59 = vpop.eup %925 }
 0x452   :  { %v428_v60 = vmul.f32 %v926_v59, %v422_v57  ;;  %v441_v61 = vadd.f32 %v777_v56, %v434_v58 }
 0x454   :  { %v435_v62 = vmul.f32 %v776_v54, %v428_v60  ;;  %881 = vmatprep.mubr.msk.f32.mxu0 %vm161_vm3, %v441_v61 }
 0x456   :  { %v442_v63 = vadd.f32 %v777_v56, %v435_v62 }
 0x458   :  { %882 = vmatmul.mubr.msk.f32.vlgmr.msra.gmra.mxu0 %vm161_vm3, %v442_v63 }
 0x459   :  { %885 = vmatpush3.msra.mxu0 %v542_v35 }
 0x45a   :  { %886 = vmatprep.subr.mxu0 %v541_v0 }
 0x45b   :  { %887 = vmatpush3.msra.mxu0 %v541_v0 }
 0x45c   :  { %888 = vmatprep.subr.mxu0 %v540_v1 }
 0x45d   :  { %889 = vmatpush3.msra.mxu0 %v540_v1 }
 0x45e   :  { %890 = vmatprep.subr.mxu0 %v539_v2 }
 0x45f   :  { %891 = vmatpush3.msra.mxu0 %v539_v2 }
 0x460   :  { %892 = vmatprep.subr.mxu0 %v538_v3 }
 0x461   :  { %893 = vmatpush3.msra.mxu0 %v538_v3 }
 0x462   :  { %894 = vmatprep.subr.mxu0 %v537_v4 }
 0x463   :  { %895 = vmatpush3.msra.mxu0 %v537_v4 }
 0x464   :  { %896 = vmatprep.subr.mxu0 %v536_v5 }
 0x465   :  { %897 = vmatpush3.msra.mxu0 %v536_v5 }
 0x466   :  { %898 = vmatprep.subr.mxu0 %v535_v6 }
 0x467   :  { %899 = vmatpush3.msra.mxu0 %v535_v6 }
 0x518   :  { %v883_v8 = vpop.f32.mrf.mxu0 }
 0x519   :  { %v530_v9 = vadd.f32 %v883_v8, %v778_v7 }
 0x51a   :  { %v524_v10 = vpop.f32.mrf.mxu0 }
 0x51b   :  { %v525_v11 = vadd.f32 %v778_v7, %v524_v10  ;;  %v534_v13 = vmax.f32 %v530_v9, 0.0 }
 0x51d   :  { %v533_v12 = vmax.f32 %v525_v11, 0.0 }
 0x51f   :  { %900 = vmatprep.mubr.msk.f32.mxu0 %vm313_vm4, %v533_v12 }
 0x520   :  { %901 = vmatmul.mubr.msk.f32.vlgmr.msra.gmra.mxu0 %vm313_vm4, %v534_v13 }
 0x5e0   :  { %v902_v16 = vpop.f32.mrf.mxu0 }
 0x5e1   :  { %v626_v17 = vadd.f32 %v902_v16, %v781_v15 }
 0x5e2   :  { %v620_v18 = vpop.f32.mrf.mxu0 }
 0x5e3   :  { %v630_v19 = vadd.f32 %v626_v17, %v1048_v22  ;;  %v621_v20 = vadd.f32 %v781_v15, %v620_v18 }
 0x5e5   :  { %v629_v21 = vadd.f32 %v621_v20, %v1051_v24  ;;  %904 = vmatpush3.msra.mxu1 %v630_v19 }
 0x5e6   :  { %905 = vmatprep.subr.mxu1 %v992_v14 }
 0x5e7   :  { %906 = vmatpush3.msra.mxu1 %v629_v21 }
 0x5e8   :  { %908 = vmatmul.mubr.msk.f32.vlgmr.msra.gmra.mxu1 %vm633_vm6, %v631_v23 }
 0x6a8   :  { %v703_v27 = vpop.f32.mrf.mxu1 }
 0x6a9   :  { %v704_v29 = vadd.f32 %v703_v27, %v632_v25 }
 0x6aa   :  { %v909_v30 = vpop.f32.mrf.mxu1 }
 0x6ab   :  { %v707_v26 = vsel %vm161_vm3, %v704_v29, 0.0  ;;  %v710_v28 = vmul.f32 %v704_v29, %v704_v29 }
 0x6ac   :  { %708 = vadd.xlane.f32.xlu1 %v707_v26 }
 0x6ad   :  { %v711_v22 = vsel %vm161_vm3, %v710_v28, 0.0 }
 0x6b0   :  { %712 = vadd.xlane.f32.xlu1 %v711_v22 }
 0x735   :  { %v709_v31 = vpop.xlane.xlu1 %708 }
 0x736   :  { %v714_v24 = vmul.f32 0.03125, %v709_v31 }
 0x738   :  { %v716_v33 = vmul.f32 %v714_v24, %v714_v24  ;;  %v719_v38 = vsub.f32 %v704_v29, %v714_v24 }
 0x739   :  { %v713_v32 = vpop.xlane.xlu1 %712 }
 0x73a   :  { %v715_v34 = vmul.f32 0.03125, %v713_v32 }
 0x73c   :  { %v717_v35 = vsub.f32 %v715_v34, %v716_v33 }
 0x73e   :  { %v718_v36 = vmax.f32 %v717_v35, 0.0 }
 0x740   :  { %v720_v37 = vadd.f32 1e-05, %v718_v36 }
 0x742   :  { %927 = vrsqrt.f32 %v720_v37 }
 0x74f   :  { %v928_v39 = vpop.eup %927 }
 0x750   :  { %v722_v41 = vmul.f32 %v928_v39, %v719_v38 }
 0x752   :  { %v728_v43 = vmul.f32 %v785_v40, %v722_v41 }
 0x754   :  { %v734_v44 = vadd.f32 %v786_v42, %v728_v43 }
 0x756   :  { %v735_v46 = vmax.f32 %v734_v44, 0.0 }
 0x758   :  { %v741_v47 = vmul.f32 %v787_v45, %v735_v46 }
 0x75a   :  { %v742_v48 = vsel %vm161_vm3, %v741_v47, 0.0 }
 0x75b   :  { %743 = vadd.xlane.f32.xlu1 %v742_v48 }
 0x7e4   :  { %v744_v50 = vpop.xlane.xlu1 %743 }
 0x7e5   :  { %v746_v51 = vadd.f32 %v745_v49, %v744_v50 }
 0x7e7   :  { %747 = vst [vmem:[#allocation7] sm:$0xff] %v746_v51 }
 0x7e8   :  { %972 = shalt.err (!%p969_p0)
}
 0x7e9   :  { %757 = dma.vmem_to_hbm [thread:$0]  %s755_s29, 128, %s1080_s3, [#allocation4]  }
 0x7ea   :  { %985 = dma.done.wait [#allocation4], 128  }
 0x7eb   :  { %986 = vsyncadd [#allocation4], 4294967168 }
 0x7ec   :  { %761 = vsyncpa [#allocation3], 1 }
 0x7ed   :  { %762 = vsyncpa [#allocation4], 1 }
 0x7ee   :  { %763 = vsyncpa [#allocation5], 1 }

</bundles_post_ra>
